<compile_context>
chip_gen: v5e
topology: v5e:2x2
jax: 0.10.0
libtpu: 0.0.40
codegen_flags: <defaults>
</compile_context>

<pallas_src>
import functools
import math

import numpy as np
import jax
import jax.numpy as jnp
from jax import lax
from jax.experimental import pallas as pl
from jax.experimental.pallas import tpu as pltpu


# ----------------------------- shared math ---------------------------------
def _layernorm(x, g, b, eps=1e-12):
    mu = jnp.mean(x, axis=-1, keepdims=True)
    var = jnp.mean((x - mu) ** 2, axis=-1, keepdims=True)
    return (x - mu) * lax.rsqrt(var + eps) * g + b


def _bf16(a):
    return a if a.dtype == jnp.bfloat16 else a.astype(jnp.bfloat16)


def _mm(a, b):
    # bf16 operands, f32 accumulation (weights are already bf16 -> no-op cast).
    return jnp.dot(_bf16(a), _bf16(b), preferred_element_type=jnp.float32)


def _mm_nt(a, b):
    # a[M,K] @ b[N,K]^T -> [M,N] without an explicit transpose.
    return lax.dot_general(_bf16(a), _bf16(b),
                           (((1,), (1,)), ((), ())),
                           preferred_element_type=jnp.float32)


# ------------------------------- kernel -------------------------------------
def _bert_prompt_kernel(
    ids_ref, midx_ref, bias_ref, tok_emb_ref, pos_emb_ref,
    wqkv_ref, bqkv_ref, wo_ref, bo_ref,
    ln0_g_ref, ln0_b_ref, ln1_g_ref, ln1_b_ref,
    w1_ref, b1_ref, w2_ref, b2_ref, ln2_g_ref, ln2_b_ref,
    wh_ref, bh_ref, out_ref, x_scr, *, B, S, NH):
    ids = ids_ref[...]                                    # [B*S, 1] int32
    V, H = tok_emb_ref.shape
    DH = H // NH
    BS = B * S
    scale = 1.0 / math.sqrt(DH)

    # ---- embeddings: one-hot @ bf16 embedding table on the MXU (toy V) ------
    # TODO(synk): switch to an index-driven DMA gather once V grows.
    iota_v = lax.broadcasted_iota(jnp.int32, (BS, V), 1)
    onehot = (ids == iota_v).astype(jnp.bfloat16)         # [BS, V]
    x = _mm(onehot, tok_emb_ref[...]) + pos_emb_ref[...]  # [BS, H], pos pre-tiled
    x = _layernorm(x, ln0_g_ref[...], ln0_b_ref[...])

    # ---- single transformer encoder layer ----
    # One fused QKV projection for all heads, then heads stacked along the
    # sublane axis so all heads share one scores/softmax/ctx pass; the
    # head+sequence block-diagonal (+padding) additive bias is precomputed.
    qkv = _mm(x, wqkv_ref[...]) + bqkv_ref[...]           # [BS, NH*3*DH] f32
    q_s = jnp.concatenate(                                # [NH*BS, DH]
        [qkv[:, h * 3 * DH + 0 * DH: h * 3 * DH + 1 * DH] for h in range(NH)], axis=0)
    k_s = jnp.concatenate(
        [qkv[:, h * 3 * DH + 1 * DH: h * 3 * DH + 2 * DH] for h in range(NH)], axis=0)
    v_s = jnp.concatenate(
        [qkv[:, h * 3 * DH + 2 * DH: h * 3 * DH + 3 * DH] for h in range(NH)], axis=0)

    s = _mm_nt(q_s, k_s) * scale + bias_ref[...]          # [NH*BS, NH*BS]
    # No row-max subtraction: bias is a finite -1e9 and scaled scores are O(1),
    # so exp cannot overflow; masked entries underflow to exactly 0.
    p = jnp.exp(s)
    p = p * pl.reciprocal(jnp.sum(p, axis=-1, keepdims=True), approx=True)
    ctx = _mm(p, v_s)                                     # [NH*BS, DH]
    # concat heads back onto lanes -> [BS, H], then single output projection.
    ctx_cat = jnp.concatenate(
        [ctx[h * BS:(h + 1) * BS, :] for h in range(NH)], axis=1)
    attn = _mm(ctx_cat, wo_ref[...])                      # [BS, H]
    x = _layernorm(x + attn + bo_ref[...], ln1_g_ref[...], ln1_b_ref[...])

    h1 = jax.nn.gelu(_mm(x, w1_ref[...]) + b1_ref[...], approximate=True)
    ffn = _mm(h1, w2_ref[...]) + b2_ref[...]
    x = _layernorm(x + ffn, ln2_g_ref[...], ln2_b_ref[...])

    # ---- BertPrompt head: gather the [MASK] row of each sequence directly
    # (SMEM row indices, no one-hot matmul), then project with the folded
    # [H, 2] head (kept in f32 for precision headroom).
    x_scr[...] = x
    rows = [x_scr[pl.ds(midx_ref[b], 1), :] for b in range(B)]
    x_mask = jnp.concatenate(rows, axis=0)                # [B, H] f32
    out_ref[...] = jnp.dot(x_mask, wh_ref[...],
                           preferred_element_type=jnp.float32) + bh_ref[...]


# ------------------------------ wrapper --------------------------------------
def bert_prompt(params, input_ids, attention_mask, p_neg, p_pos, mask_id,
                num_heads=2):
    B, S = input_ids.shape
    V, H = params["tok_emb"].shape
    DH = H // num_heads
    BS = B * S
    bf16 = jnp.bfloat16

    ids_flat = input_ids.reshape(BS, 1).astype(jnp.int32)

    # flat row index of the [MASK] token of each sequence (one per sequence)
    mask_pos = jnp.argmax((input_ids == mask_id).astype(jnp.int32), axis=1)
    mask_idx = (jnp.arange(B) * S + mask_pos).astype(jnp.int32)

    # head+sequence block-diagonal (+ padding) additive bias [NH*BS, NH*BS]
    amask = attention_mask.astype(jnp.float32).reshape(BS)
    seq_id = jnp.repeat(jnp.arange(B), S)
    allowed_tok = (seq_id[:, None] == seq_id[None, :]).astype(jnp.float32) * amask[None, :]
    head_id = jnp.repeat(jnp.arange(num_heads), BS)
    same_head = (head_id[:, None] == head_id[None, :]).astype(jnp.float32)
    bias_big = (1.0 - same_head * jnp.tile(allowed_tok, (num_heads, num_heads))) * (-1e9)

    # fold (weight-tied) vocab projection + p_neg/p_pos means into a [H, 2]
    # head, computed in f32 from the f32 embedding table.
    pn = jnp.asarray(p_neg)
    pp = jnp.asarray(p_pos)
    w_head = jnp.stack([params["tok_emb"][pn].mean(axis=0),
                        params["tok_emb"][pp].mean(axis=0)], axis=1)   # [H, 2]
    b_head = jnp.stack([params["vocab_b"][0, pn].mean(),
                        params["vocab_b"][0, pp].mean()])[None, :]     # [1, 2]

    # fused, per-head-grouped QKV weights [H, NH*3*DH] (bf16) + bias
    wq, wk, wv = params["wq"], params["wk"], params["wv"]
    bq, bk, bv = params["bq"], params["bk"], params["bv"]
    wblocks, bblocks = [], []
    for h in range(num_heads):
        sl = slice(h * DH, (h + 1) * DH)
        wblocks += [wq[:, sl], wk[:, sl], wv[:, sl]]
        bblocks += [bq[:, sl], bk[:, sl], bv[:, sl]]
    w_qkv = jnp.concatenate(wblocks, axis=1).astype(bf16)              # [H, NH*3*DH]
    b_qkv = jnp.concatenate(bblocks, axis=1)                           # [1, NH*3*DH]

    pos_tiled = jnp.tile(params["pos_emb"], (B, 1))                    # [BS, H] f32

    inputs = [
        ids_flat, mask_idx, bias_big,
        params["tok_emb"].astype(bf16), pos_tiled,
        w_qkv, b_qkv, params["wo"].astype(bf16), params["bo"],
        params["ln0_g"], params["ln0_b"], params["ln1_g"], params["ln1_b"],
        params["w1"].astype(bf16), params["b1"],
        params["w2"].astype(bf16), params["b2"],
        params["ln2_g"], params["ln2_b"],
        w_head, b_head,
    ]

    kernel = functools.partial(_bert_prompt_kernel, B=B, S=S, NH=num_heads)
    vmem = lambda: pl.BlockSpec(memory_space=pltpu.MemorySpace.VMEM)
    smem = pl.BlockSpec(memory_space=pltpu.MemorySpace.SMEM)
    in_specs = [vmem(), smem] + [vmem() for _ in inputs[2:]]
    return pl.pallas_call(
        kernel,
        out_shape=jax.ShapeDtypeStruct((B, 2), jnp.float32),
        in_specs=in_specs,
        out_specs=vmem(),
        scratch_shapes=[pltpu.VMEM((BS, H), jnp.float32)],
    )(*inputs)


# ------------------------ pure-JAX reference ---------------------------------
def bert_prompt_ref(params, input_ids, attention_mask, p_neg, p_pos, mask_id,
                    num_heads=2):
    B, S = input_ids.shape
    V, H = params["tok_emb"].shape
    DH = H // num_heads
    x = params["tok_emb"][input_ids] + params["pos_emb"][None]
    x = _layernorm(x, params["ln0_g"], params["ln0_b"])
    q = (x @ params["wq"] + params["bq"]).reshape(B, S, num_heads, DH)
    k = (x @ params["wk"] + params["bk"]).reshape(B, S, num_heads, DH)
    v = (x @ params["wv"] + params["bv"]).reshape(B, S, num_heads, DH)
    s = jnp.einsum("bqhd,bkhd->bhqk", q, k) / math.sqrt(DH)
    s = s + ((1.0 - attention_mask.astype(jnp.float32)) * -1e9)[:, None, None, :]
    p = jax.nn.softmax(s, axis=-1)
    ctx = jnp.einsum("bhqk,bkhd->bqhd", p, v).reshape(B, S, H)
    x = _layernorm(x + ctx @ params["wo"] + params["bo"],
                   params["ln1_g"], params["ln1_b"])
    ffn = jax.nn.gelu(x @ params["w1"] + params["b1"],
                      approximate=True) @ params["w2"] + params["b2"]
    x = _layernorm(x + ffn, params["ln2_g"], params["ln2_b"])
    logits = jnp.einsum("bsh,vh->bsv", x, params["tok_emb"]) + params["vocab_b"]
    # exact torch semantics: logits[input_ids == mask_id]
    pos = np.asarray(input_ids == mask_id).reshape(-1)
    sel_logits = logits.reshape(B * S, V)[np.nonzero(pos)[0]]
    neg = sel_logits[:, jnp.asarray(p_neg)].mean(axis=-1, keepdims=True)
    posm = sel_logits[:, jnp.asarray(p_pos)].mean(axis=-1, keepdims=True)
    return jnp.concatenate([neg, posm], axis=-1)


# ---------------------------- param init -------------------------------------
def init_params(key, V, S, H, F):
    ks = jax.random.split(key, 8)
    std = 0.02
    n = lambda k, shp: jax.random.normal(k, shp, jnp.float32) * std
    return dict(
        tok_emb=n(ks[0], (V, H)),
        pos_emb=n(ks[1], (S, H)),
        wq=n(ks[2], (H, H)), bq=jnp.zeros((1, H), jnp.float32),
        wk=n(ks[3], (H, H)), bk=jnp.zeros((1, H), jnp.float32),
        wv=n(ks[4], (H, H)), bv=jnp.zeros((1, H), jnp.float32),
        wo=n(ks[5], (H, H)), bo=jnp.zeros((1, H), jnp.float32),
        ln0_g=jnp.ones((1, H), jnp.float32), ln0_b=jnp.zeros((1, H), jnp.float32),
        ln1_g=jnp.ones((1, H), jnp.float32), ln1_b=jnp.zeros((1, H), jnp.float32),
        w1=n(ks[6], (H, F)), b1=jnp.zeros((1, F), jnp.float32),
        w2=n(ks[7], (F, H)), b2=jnp.zeros((1, H), jnp.float32),
        ln2_g=jnp.ones((1, H), jnp.float32), ln2_b=jnp.zeros((1, H), jnp.float32),
        vocab_b=jnp.zeros((1, V), jnp.float32),
    )


if __name__ == "__main__":
    B, S, H, V, F, NH = 2, 8, 32, 64, 64, 2
    mask_id = 4
    p_neg = [3, 7, 11]          # "bad"-prompt vocab ids
    p_pos = [5, 9, 13]          # "good"-prompt vocab ids

    key = jax.random.PRNGKey(0)
    kp, ki = jax.random.split(key)
    params = init_params(kp, V, S, H, F)

    # input_ids: random tokens, exactly one [MASK] per sequence (at position 3)
    ids = jax.random.randint(ki, (B, S), 0, V - 1, dtype=jnp.int32)
    ids = jnp.where(ids >= mask_id, ids + 1, ids)   # avoid accidental [MASK]
    ids = ids.at[:, 3].set(mask_id)
    attention_mask = jnp.ones((B, S), jnp.float32).at[1, S - 1].set(0.0)

    out = bert_prompt(params, ids, attention_mask, p_neg, p_pos, mask_id, NH)
    out = jax.block_until_ready(out)

    ref = bert_prompt_ref(params, ids, attention_mask, p_neg, p_pos, mask_id, NH)
    assert out.shape == (B, 2), out.shape
    assert jnp.all(jnp.isfinite(out))
    assert jnp.allclose(out, ref, rtol=5e-3, atol=5e-3), (out, ref)

    print("KERNEL_OK")
</pallas_src>

<mosaic_0001>
module attributes {stable_mosaic.version = 11 : i64} {
  func.func @_bert_prompt_kernel(%arg0: memref<16x1xi32, #tpu.memory_space<vmem>>, %arg1: memref<2xi32, #tpu.memory_space<smem>>, %arg2: memref<32x32xf32, #tpu.memory_space<vmem>>, %arg3: memref<64x32xbf16, #tpu.memory_space<vmem>>, %arg4: memref<16x32xf32, #tpu.memory_space<vmem>>, %arg5: memref<32x96xbf16, #tpu.memory_space<vmem>>, %arg6: memref<1x96xf32, #tpu.memory_space<vmem>>, %arg7: memref<32x32xbf16, #tpu.memory_space<vmem>>, %arg8: memref<1x32xf32, #tpu.memory_space<vmem>>, %arg9: memref<1x32xf32, #tpu.memory_space<vmem>>, %arg10: memref<1x32xf32, #tpu.memory_space<vmem>>, %arg11: memref<1x32xf32, #tpu.memory_space<vmem>>, %arg12: memref<1x32xf32, #tpu.memory_space<vmem>>, %arg13: memref<32x64xbf16, #tpu.memory_space<vmem>>, %arg14: memref<1x64xf32, #tpu.memory_space<vmem>>, %arg15: memref<64x32xbf16, #tpu.memory_space<vmem>>, %arg16: memref<1x32xf32, #tpu.memory_space<vmem>>, %arg17: memref<1x32xf32, #tpu.memory_space<vmem>>, %arg18: memref<1x32xf32, #tpu.memory_space<vmem>>, %arg19: memref<32x2xf32, #tpu.memory_space<vmem>>, %arg20: memref<1x2xf32, #tpu.memory_space<vmem>>, %arg21: memref<2x2xf32, #tpu.memory_space<vmem>>, %arg22: memref<16x32xf32, #tpu.memory_space<vmem>>) attributes {dimension_semantics = [], scalar_prefetch = 0 : i64, scratch_operands = 1 : i64, tpu.core_type = #tpu.core_type<tc>} {
    %c0 = arith.constant 0 : index
    %c0_0 = arith.constant 0 : index
    %0 = vector.load %arg0[%c0, %c0_0] : memref<16x1xi32, #tpu.memory_space<vmem>>, vector<16x1xi32>
    %1 = tpu.iota {dimensions = array<i32: 1>} : vector<16x64xi32>
    %2 = vector.broadcast %0 : vector<16x1xi32> to vector<16x64xi32>
    %3 = arith.cmpi eq, %2, %1 : vector<16x64xi32>
    %4 = arith.extui %3 : vector<16x64xi1> to vector<16x64xi32>
    %5 = arith.sitofp %4 : vector<16x64xi32> to vector<16x64xf32>
    %6 = arith.truncf %5 : vector<16x64xf32> to vector<16x64xbf16>
    %c0_1 = arith.constant 0 : index
    %c0_2 = arith.constant 0 : index
    %7 = vector.load %arg3[%c0_1, %c0_2] : memref<64x32xbf16, #tpu.memory_space<vmem>>, vector<64x32xbf16>
    %cst = arith.constant dense<0.000000e+00> : vector<16x32xf32>
    %8 = tpu.matmul %6, %7, %cst {dimension_numbers = #tpu.dot_dimension_numbers<[1], [0], [0], [1], [0, 0, 1, 1], [], []>} : vector<16x64xbf16>, vector<64x32xbf16>, vector<16x32xf32> -> vector<16x32xf32>
    %c0_3 = arith.constant 0 : index
    %c0_4 = arith.constant 0 : index
    %9 = vector.load %arg4[%c0_3, %c0_4] : memref<16x32xf32, #tpu.memory_space<vmem>>, vector<16x32xf32>
    %10 = arith.addf %8, %9 : vector<16x32xf32>
    %c0_5 = arith.constant 0 : index
    %c0_6 = arith.constant 0 : index
    %11 = vector.load %arg9[%c0_5, %c0_6] : memref<1x32xf32, #tpu.memory_space<vmem>>, vector<1x32xf32>
    %c0_7 = arith.constant 0 : index
    %c0_8 = arith.constant 0 : index
    %12 = vector.load %arg10[%c0_7, %c0_8] : memref<1x32xf32, #tpu.memory_space<vmem>>, vector<1x32xf32>
    %cst_9 = arith.constant dense<0.000000e+00> : vector<16xf32>
    %13 = vector.multi_reduction <add>, %10, %cst_9 [1] : vector<16x32xf32> to vector<16xf32>
    %14 = vector.shape_cast %13 : vector<16xf32> to vector<16x1xf32>
    %cst_10 = arith.constant 3.200000e+01 : f32
    %15 = vector.broadcast %cst_10 : f32 to vector<16x1xf32>
    %16 = arith.divf %14, %15 : vector<16x1xf32>
    %17 = vector.broadcast %16 : vector<16x1xf32> to vector<16x32xf32>
    %18 = arith.subf %10, %17 : vector<16x32xf32>
    %19 = arith.mulf %18, %18 : vector<16x32xf32>
    %cst_11 = arith.constant dense<0.000000e+00> : vector<16xf32>
    %20 = vector.multi_reduction <add>, %19, %cst_11 [1] : vector<16x32xf32> to vector<16xf32>
    %21 = vector.shape_cast %20 : vector<16xf32> to vector<16x1xf32>
    %cst_12 = arith.constant 3.200000e+01 : f32
    %22 = vector.broadcast %cst_12 : f32 to vector<16x1xf32>
    %23 = arith.divf %21, %22 : vector<16x1xf32>
    %24 = vector.broadcast %16 : vector<16x1xf32> to vector<16x32xf32>
    %25 = arith.subf %10, %24 : vector<16x32xf32>
    %cst_13 = arith.constant 9.99999996E-13 : f32
    %26 = vector.broadcast %cst_13 : f32 to vector<16x1xf32>
    %27 = arith.addf %23, %26 : vector<16x1xf32>
    %28 = math.rsqrt %27 : vector<16x1xf32>
    %29 = vector.broadcast %28 : vector<16x1xf32> to vector<16x32xf32>
    %30 = arith.mulf %25, %29 : vector<16x32xf32>
    %31 = vector.broadcast %11 : vector<1x32xf32> to vector<16x32xf32>
    %32 = arith.mulf %30, %31 : vector<16x32xf32>
    %33 = vector.broadcast %12 : vector<1x32xf32> to vector<16x32xf32>
    %34 = arith.addf %32, %33 : vector<16x32xf32>
    %c0_14 = arith.constant 0 : index
    %c0_15 = arith.constant 0 : index
    %35 = vector.load %arg5[%c0_14, %c0_15] : memref<32x96xbf16, #tpu.memory_space<vmem>>, vector<32x96xbf16>
    %36 = arith.truncf %34 : vector<16x32xf32> to vector<16x32xbf16>
    %cst_16 = arith.constant dense<0.000000e+00> : vector<16x96xf32>
    %37 = tpu.matmul %36, %35, %cst_16 {dimension_numbers = #tpu.dot_dimension_numbers<[1], [0], [0], [1], [0, 0, 1, 1], [], []>} : vector<16x32xbf16>, vector<32x96xbf16>, vector<16x96xf32> -> vector<16x96xf32>
    %c0_17 = arith.constant 0 : index
    %c0_18 = arith.constant 0 : index
    %38 = vector.load %arg6[%c0_17, %c0_18] : memref<1x96xf32, #tpu.memory_space<vmem>>, vector<1x96xf32>
    %39 = vector.broadcast %38 : vector<1x96xf32> to vector<16x96xf32>
    %40 = arith.addf %37, %39 : vector<16x96xf32>
    %41 = vector.extract_strided_slice %40 {offsets = [0, 0], sizes = [16, 16], strides = [1, 1]} : vector<16x96xf32> to vector<16x16xf32>
    %42 = vector.extract_strided_slice %40 {offsets = [0, 48], sizes = [16, 16], strides = [1, 1]} : vector<16x96xf32> to vector<16x16xf32>
    %43 = tpu.concatenate %41, %42 in 0 : vector<16x16xf32>, vector<16x16xf32> -> vector<32x16xf32>
    %44 = vector.extract_strided_slice %40 {offsets = [0, 16], sizes = [16, 16], strides = [1, 1]} : vector<16x96xf32> to vector<16x16xf32>
    %45 = vector.extract_strided_slice %40 {offsets = [0, 64], sizes = [16, 16], strides = [1, 1]} : vector<16x96xf32> to vector<16x16xf32>
    %46 = tpu.concatenate %44, %45 in 0 : vector<16x16xf32>, vector<16x16xf32> -> vector<32x16xf32>
    %47 = vector.extract_strided_slice %40 {offsets = [0, 32], sizes = [16, 16], strides = [1, 1]} : vector<16x96xf32> to vector<16x16xf32>
    %48 = vector.extract_strided_slice %40 {offsets = [0, 80], sizes = [16, 16], strides = [1, 1]} : vector<16x96xf32> to vector<16x16xf32>
    %49 = tpu.concatenate %47, %48 in 0 : vector<16x16xf32>, vector<16x16xf32> -> vector<32x16xf32>
    %50 = arith.truncf %43 : vector<32x16xf32> to vector<32x16xbf16>
    %51 = arith.truncf %46 : vector<32x16xf32> to vector<32x16xbf16>
    %cst_19 = arith.constant dense<0.000000e+00> : vector<32x32xf32>
    %52 = tpu.matmul %50, %51, %cst_19 {dimension_numbers = #tpu.dot_dimension_numbers<[1], [1], [0], [0], [0, 0, 1, 0], [], []>} : vector<32x16xbf16>, vector<32x16xbf16>, vector<32x32xf32> -> vector<32x32xf32>
    %cst_20 = arith.constant 2.500000e-01 : f32
    %53 = vector.broadcast %cst_20 : f32 to vector<32x32xf32>
    %54 = arith.mulf %52, %53 : vector<32x32xf32>
    %c0_21 = arith.constant 0 : index
    %c0_22 = arith.constant 0 : index
    %55 = vector.load %arg2[%c0_21, %c0_22] : memref<32x32xf32, #tpu.memory_space<vmem>>, vector<32x32xf32>
    %56 = arith.addf %54, %55 : vector<32x32xf32>
    %57 = math.exp %56 : vector<32x32xf32>
    %cst_23 = arith.constant dense<0.000000e+00> : vector<32xf32>
    %58 = vector.multi_reduction <add>, %57, %cst_23 [1] : vector<32x32xf32> to vector<32xf32>
    %59 = vector.shape_cast %58 : vector<32xf32> to vector<32x1xf32>
    %60 = tpu.reciprocal %59 {approx = true} : vector<32x1xf32> -> vector<32x1xf32>
    %61 = vector.broadcast %60 : vector<32x1xf32> to vector<32x32xf32>
    %62 = arith.mulf %57, %61 : vector<32x32xf32>
    %63 = arith.truncf %62 : vector<32x32xf32> to vector<32x32xbf16>
    %64 = arith.truncf %49 : vector<32x16xf32> to vector<32x16xbf16>
    %cst_24 = arith.constant dense<0.000000e+00> : vector<32x16xf32>
    %65 = tpu.matmul %63, %64, %cst_24 {dimension_numbers = #tpu.dot_dimension_numbers<[1], [0], [0], [1], [0, 0, 1, 1], [], []>} : vector<32x32xbf16>, vector<32x16xbf16>, vector<32x16xf32> -> vector<32x16xf32>
    %66 = vector.extract_strided_slice %65 {offsets = [0, 0], sizes = [16, 16], strides = [1, 1]} : vector<32x16xf32> to vector<16x16xf32>
    %67 = vector.extract_strided_slice %65 {offsets = [16, 0], sizes = [16, 16], strides = [1, 1]} : vector<32x16xf32> to vector<16x16xf32>
    %68 = tpu.concatenate %66, %67 in 1 : vector<16x16xf32>, vector<16x16xf32> -> vector<16x32xf32>
    %c0_25 = arith.constant 0 : index
    %c0_26 = arith.constant 0 : index
    %69 = vector.load %arg7[%c0_25, %c0_26] : memref<32x32xbf16, #tpu.memory_space<vmem>>, vector<32x32xbf16>
    %70 = arith.truncf %68 : vector<16x32xf32> to vector<16x32xbf16>
    %cst_27 = arith.constant dense<0.000000e+00> : vector<16x32xf32>
    %71 = tpu.matmul %70, %69, %cst_27 {dimension_numbers = #tpu.dot_dimension_numbers<[1], [0], [0], [1], [0, 0, 1, 1], [], []>} : vector<16x32xbf16>, vector<32x32xbf16>, vector<16x32xf32> -> vector<16x32xf32>
    %72 = arith.addf %34, %71 : vector<16x32xf32>
    %c0_28 = arith.constant 0 : index
    %c0_29 = arith.constant 0 : index
    %73 = vector.load %arg8[%c0_28, %c0_29] : memref<1x32xf32, #tpu.memory_space<vmem>>, vector<1x32xf32>
    %74 = vector.broadcast %73 : vector<1x32xf32> to vector<16x32xf32>
    %75 = arith.addf %72, %74 : vector<16x32xf32>
    %c0_30 = arith.constant 0 : index
    %c0_31 = arith.constant 0 : index
    %76 = vector.load %arg11[%c0_30, %c0_31] : memref<1x32xf32, #tpu.memory_space<vmem>>, vector<1x32xf32>
    %c0_32 = arith.constant 0 : index
    %c0_33 = arith.constant 0 : index
    %77 = vector.load %arg12[%c0_32, %c0_33] : memref<1x32xf32, #tpu.memory_space<vmem>>, vector<1x32xf32>
    %cst_34 = arith.constant dense<0.000000e+00> : vector<16xf32>
    %78 = vector.multi_reduction <add>, %75, %cst_34 [1] : vector<16x32xf32> to vector<16xf32>
    %79 = vector.shape_cast %78 : vector<16xf32> to vector<16x1xf32>
    %cst_35 = arith.constant 3.200000e+01 : f32
    %80 = vector.broadcast %cst_35 : f32 to vector<16x1xf32>
    %81 = arith.divf %79, %80 : vector<16x1xf32>
    %82 = vector.broadcast %81 : vector<16x1xf32> to vector<16x32xf32>
    %83 = arith.subf %75, %82 : vector<16x32xf32>
    %84 = arith.mulf %83, %83 : vector<16x32xf32>
    %cst_36 = arith.constant dense<0.000000e+00> : vector<16xf32>
    %85 = vector.multi_reduction <add>, %84, %cst_36 [1] : vector<16x32xf32> to vector<16xf32>
    %86 = vector.shape_cast %85 : vector<16xf32> to vector<16x1xf32>
    %cst_37 = arith.constant 3.200000e+01 : f32
    %87 = vector.broadcast %cst_37 : f32 to vector<16x1xf32>
    %88 = arith.divf %86, %87 : vector<16x1xf32>
    %89 = vector.broadcast %81 : vector<16x1xf32> to vector<16x32xf32>
    %90 = arith.subf %75, %89 : vector<16x32xf32>
    %cst_38 = arith.constant 9.99999996E-13 : f32
    %91 = vector.broadcast %cst_38 : f32 to vector<16x1xf32>
    %92 = arith.addf %88, %91 : vector<16x1xf32>
    %93 = math.rsqrt %92 : vector<16x1xf32>
    %94 = vector.broadcast %93 : vector<16x1xf32> to vector<16x32xf32>
    %95 = arith.mulf %90, %94 : vector<16x32xf32>
    %96 = vector.broadcast %76 : vector<1x32xf32> to vector<16x32xf32>
    %97 = arith.mulf %95, %96 : vector<16x32xf32>
    %98 = vector.broadcast %77 : vector<1x32xf32> to vector<16x32xf32>
    %99 = arith.addf %97, %98 : vector<16x32xf32>
    %c0_39 = arith.constant 0 : index
    %c0_40 = arith.constant 0 : index
    %100 = vector.load %arg13[%c0_39, %c0_40] : memref<32x64xbf16, #tpu.memory_space<vmem>>, vector<32x64xbf16>
    %101 = arith.truncf %99 : vector<16x32xf32> to vector<16x32xbf16>
    %cst_41 = arith.constant dense<0.000000e+00> : vector<16x64xf32>
    %102 = tpu.matmul %101, %100, %cst_41 {dimension_numbers = #tpu.dot_dimension_numbers<[1], [0], [0], [1], [0, 0, 1, 1], [], []>} : vector<16x32xbf16>, vector<32x64xbf16>, vector<16x64xf32> -> vector<16x64xf32>
    %c0_42 = arith.constant 0 : index
    %c0_43 = arith.constant 0 : index
    %103 = vector.load %arg14[%c0_42, %c0_43] : memref<1x64xf32, #tpu.memory_space<vmem>>, vector<1x64xf32>
    %104 = vector.broadcast %103 : vector<1x64xf32> to vector<16x64xf32>
    %105 = arith.addf %102, %104 : vector<16x64xf32>
    %106 = arith.mulf %105, %105 : vector<16x64xf32>
    %107 = arith.mulf %105, %106 : vector<16x64xf32>
    %cst_44 = arith.constant 4.471500e-02 : f32
    %108 = vector.broadcast %cst_44 : f32 to vector<16x64xf32>
    %109 = arith.mulf %108, %107 : vector<16x64xf32>
    %110 = arith.addf %105, %109 : vector<16x64xf32>
    %cst_45 = arith.constant 0.797884583 : f32
    %111 = vector.broadcast %cst_45 : f32 to vector<16x64xf32>
    %112 = arith.mulf %111, %110 : vector<16x64xf32>
    %113 = math.tanh %112 : vector<16x64xf32>
    %cst_46 = arith.constant 1.000000e+00 : f32
    %114 = vector.broadcast %cst_46 : f32 to vector<16x64xf32>
    %115 = arith.addf %114, %113 : vector<16x64xf32>
    %cst_47 = arith.constant 5.000000e-01 : f32
    %116 = vector.broadcast %cst_47 : f32 to vector<16x64xf32>
    %117 = arith.mulf %116, %115 : vector<16x64xf32>
    %118 = arith.mulf %105, %117 : vector<16x64xf32>
    %c0_48 = arith.constant 0 : index
    %c0_49 = arith.constant 0 : index
    %119 = vector.load %arg15[%c0_48, %c0_49] : memref<64x32xbf16, #tpu.memory_space<vmem>>, vector<64x32xbf16>
    %120 = arith.truncf %118 : vector<16x64xf32> to vector<16x64xbf16>
    %cst_50 = arith.constant dense<0.000000e+00> : vector<16x32xf32>
    %121 = tpu.matmul %120, %119, %cst_50 {dimension_numbers = #tpu.dot_dimension_numbers<[1], [0], [0], [1], [0, 0, 1, 1], [], []>} : vector<16x64xbf16>, vector<64x32xbf16>, vector<16x32xf32> -> vector<16x32xf32>
    %c0_51 = arith.constant 0 : index
    %c0_52 = arith.constant 0 : index
    %122 = vector.load %arg16[%c0_51, %c0_52] : memref<1x32xf32, #tpu.memory_space<vmem>>, vector<1x32xf32>
    %123 = vector.broadcast %122 : vector<1x32xf32> to vector<16x32xf32>
    %124 = arith.addf %121, %123 : vector<16x32xf32>
    %125 = arith.addf %99, %124 : vector<16x32xf32>
    %c0_53 = arith.constant 0 : index
    %c0_54 = arith.constant 0 : index
    %126 = vector.load %arg17[%c0_53, %c0_54] : memref<1x32xf32, #tpu.memory_space<vmem>>, vector<1x32xf32>
    %c0_55 = arith.constant 0 : index
    %c0_56 = arith.constant 0 : index
    %127 = vector.load %arg18[%c0_55, %c0_56] : memref<1x32xf32, #tpu.memory_space<vmem>>, vector<1x32xf32>
    %cst_57 = arith.constant dense<0.000000e+00> : vector<16xf32>
    %128 = vector.multi_reduction <add>, %125, %cst_57 [1] : vector<16x32xf32> to vector<16xf32>
    %129 = vector.shape_cast %128 : vector<16xf32> to vector<16x1xf32>
    %cst_58 = arith.constant 3.200000e+01 : f32
    %130 = vector.broadcast %cst_58 : f32 to vector<16x1xf32>
    %131 = arith.divf %129, %130 : vector<16x1xf32>
    %132 = vector.broadcast %131 : vector<16x1xf32> to vector<16x32xf32>
    %133 = arith.subf %125, %132 : vector<16x32xf32>
    %134 = arith.mulf %133, %133 : vector<16x32xf32>
    %cst_59 = arith.constant dense<0.000000e+00> : vector<16xf32>
    %135 = vector.multi_reduction <add>, %134, %cst_59 [1] : vector<16x32xf32> to vector<16xf32>
    %136 = vector.shape_cast %135 : vector<16xf32> to vector<16x1xf32>
    %cst_60 = arith.constant 3.200000e+01 : f32
    %137 = vector.broadcast %cst_60 : f32 to vector<16x1xf32>
    %138 = arith.divf %136, %137 : vector<16x1xf32>
    %139 = vector.broadcast %131 : vector<16x1xf32> to vector<16x32xf32>
    %140 = arith.subf %125, %139 : vector<16x32xf32>
    %cst_61 = arith.constant 9.99999996E-13 : f32
    %141 = vector.broadcast %cst_61 : f32 to vector<16x1xf32>
    %142 = arith.addf %138, %141 : vector<16x1xf32>
    %143 = math.rsqrt %142 : vector<16x1xf32>
    %144 = vector.broadcast %143 : vector<16x1xf32> to vector<16x32xf32>
    %145 = arith.mulf %140, %144 : vector<16x32xf32>
    %146 = vector.broadcast %126 : vector<1x32xf32> to vector<16x32xf32>
    %147 = arith.mulf %145, %146 : vector<16x32xf32>
    %148 = vector.broadcast %127 : vector<1x32xf32> to vector<16x32xf32>
    %149 = arith.addf %147, %148 : vector<16x32xf32>
    %c0_62 = arith.constant 0 : index
    %c0_63 = arith.constant 0 : index
    %150 = vector.load %arg22[%c0_62, %c0_63] : memref<16x32xf32, #tpu.memory_space<vmem>>, vector<16x32xf32>
    tpu.vector_store %arg22[%c0_62, %c0_63], %149 {strides = array<i32>} : memref<16x32xf32, #tpu.memory_space<vmem>>, vector<16x32xf32>,
    %c0_64 = arith.constant 0 : index
    %151 = memref.load %arg1[%c0_64] : memref<2xi32, #tpu.memory_space<smem>>
    %152 = arith.index_cast %151 : i32 to index
    %c0_65 = arith.constant 0 : index
    %153 = vector.load %arg22[%152, %c0_65] : memref<16x32xf32, #tpu.memory_space<vmem>>, vector<1x32xf32>
    %c1 = arith.constant 1 : index
    %154 = memref.load %arg1[%c1] : memref<2xi32, #tpu.memory_space<smem>>
    %155 = arith.index_cast %154 : i32 to index
    %c0_66 = arith.constant 0 : index
    %156 = vector.load %arg22[%155, %c0_66] : memref<16x32xf32, #tpu.memory_space<vmem>>, vector<1x32xf32>
    %157 = tpu.concatenate %153, %156 in 0 : vector<1x32xf32>, vector<1x32xf32> -> vector<2x32xf32>
    %c0_67 = arith.constant 0 : index
    %c0_68 = arith.constant 0 : index
    %158 = vector.load %arg19[%c0_67, %c0_68] : memref<32x2xf32, #tpu.memory_space<vmem>>, vector<32x2xf32>
    %cst_69 = arith.constant dense<0.000000e+00> : vector<2x2xf32>
    %159 = tpu.matmul %157, %158, %cst_69 {dimension_numbers = #tpu.dot_dimension_numbers<[1], [0], [0], [1], [0, 0, 1, 1], [], []>} : vector<2x32xf32>, vector<32x2xf32>, vector<2x2xf32> -> vector<2x2xf32>
    %c0_70 = arith.constant 0 : index
    %c0_71 = arith.constant 0 : index
    %160 = vector.load %arg20[%c0_70, %c0_71] : memref<1x2xf32, #tpu.memory_space<vmem>>, vector<1x2xf32>
    %161 = vector.broadcast %160 : vector<1x2xf32> to vector<2x2xf32>
    %162 = arith.addf %159, %161 : vector<2x2xf32>
    %c0_72 = arith.constant 0 : index
    %c0_73 = arith.constant 0 : index
    %163 = vector.load %arg21[%c0_72, %c0_73] : memref<2x2xf32, #tpu.memory_space<vmem>>, vector<2x2xf32>
    tpu.vector_store %arg21[%c0_72, %c0_73], %162 {strides = array<i32>} : memref<2x2xf32, #tpu.memory_space<vmem>>, vector<2x2xf32>,
    return
  }
}

</mosaic_0001>

<bundles_post_ra>
// kernel: tpu_custom_call.1
= control target key start
LH: loop header
LB: loop body
LE: loop exit
PB: predicated region body
PF: predicated region fallthrough
CT: control target
= control target key end

     0   :  { %s1194_s0 = inlined_call_operand.vmem [shape: s32[16,1], index: 0, kind: input, shape index: {}]   ;;  %s1195_s1 = inlined_call_operand.vmem [shape: s32[2], index: 1, kind: input, shape index: {}]   ;;  %s1196_s2 = inlined_call_operand.vmem [shape: f32[32,32], index: 2, kind: input, shape index: {}]   ;;  %s1197_s3 = inlined_call_operand.vmem [shape: bf16[64,32], index: 3, kind: input, shape index: {}]   ;;  %s1198_s4 = inlined_call_operand.vmem [shape: f32[16,32], index: 4, kind: input, shape index: {}]   ;;  %s1199_s5 = inlined_call_operand.vmem [shape: bf16[32,96], index: 5, kind: input, shape index: {}]   ;;  %s1200_s6 = inlined_call_operand.vmem [shape: f32[1,96], index: 6, kind: input, shape index: {}]   ;;  %s1201_s7 = inlined_call_operand.vmem [shape: bf16[32,32], index: 7, kind: input, shape index: {}]   ;;  %s1202_s8 = inlined_call_operand.vmem [shape: f32[1,32], index: 8, kind: input, shape index: {}]   ;;  %s1203_s9 = inlined_call_operand.vmem [shape: f32[1,32], index: 9, kind: input, shape index: {}]   ;;  %s1204_s10 = inlined_call_operand.vmem [shape: f32[1,32], index: 10, kind: input, shape index: {}]   ;;  %s1205_s11 = inlined_call_operand.vmem [shape: f32[1,32], index: 11, kind: input, shape index: {}]   ;;  %s1206_s12 = inlined_call_operand.vmem [shape: f32[1,32], index: 12, kind: input, shape index: {}]   ;;  %s1207_s13 = inlined_call_operand.vmem [shape: bf16[32,64], index: 13, kind: input, shape index: {}]   ;;  %s1208_s14 = inlined_call_operand.vmem [shape: f32[1,64], index: 14, kind: input, shape index: {}]   ;;  %s1209_s15 = inlined_call_operand.vmem [shape: bf16[64,32], index: 15, kind: input, shape index: {}]   ;;  %s1210_s16 = inlined_call_operand.vmem [shape: f32[1,32], index: 16, kind: input, shape index: {}]   ;;  %s1211_s17 = inlined_call_operand.vmem [shape: f32[1,32], index: 17, kind: input, shape index: {}]   ;;  %s1212_s18 = inlined_call_operand.vmem [shape: f32[1,32], index: 18, kind: input, shape index: {}]   ;;  %s1213_s19 = inlined_call_operand.vmem [shape: f32[32,2], index: 19, kind: input, shape index: {}]   ;;  %s1214_s20 = inlined_call_operand.vmem [shape: f32[1,2], index: 20, kind: input, shape index: {}]   ;;  %s1215_s21 = inlined_call_operand.hbm [shape: f32[2,2], index: 21, kind: output, shape index: {}]  }
   0x1   :  { %1221 = sst [smem:[#allocation9_spill]] %s1194_s0 }
   0x2   :  { %1222 = sst [smem:[#allocation10_spill]] %s1195_s1 }
   0x3   :  { %1223 = sst [smem:[#allocation11_spill]] %s1196_s2 }
   0x4   :  { %1224 = sst [smem:[#allocation12_spill]] %s1197_s3 }
   0x5   :  { %1225 = sst [smem:[#allocation13_spill]] %s1198_s4 }
   0x6   :  { %1226 = sst [smem:[#allocation14_spill]] %s1199_s5 }
   0x7   :  { %26 = vsyncpa [#allocation5], 0 }
   0x8   :  { %27 = vsyncpa [#allocation4], 0  ;;  %s1227_s26 = sld [smem:[#allocation10_spill]]  ;;  %s904_s3 = smov [#allocation3]  }
   0xe   :  { %s35_s27 = sshll.u32 %s1227_s26, 4  ;;  %s36_s27 = int_to_ptr.vmem [resolvable:$true] %s35_s27 }
   0xf   :  { %38 = dma.vmem_to_smem %s36_s27, 16, %s904_s3, [#allocation5]  }
  0x10   :  { %900 = dma.done.wait [#allocation5], 16  }
  0x11   :  { %901 = vsyncadd [#allocation5], 4294967280 }
  0x12   :  { %81 = sfence }
  0x13   :  { %s1228_s0 = sld [smem:[#allocation9_spill]]  ;;  %v905_v2 = vmov 0   ;;  %v85_v7 = vlaneseq  ;;  %v906_v11 = vmov 0.0   ;;  %vm134_vm2 = vcmask 523264   ;;  %v819_v61 = vld [vmem:[%s1203_s9] ss:$0 sm:$0xff] }
  0x14   :  { %s1229_s5 = sld [smem:[#allocation12_spill]]  ;;  %808 = vset.pattern.permute.xlu0 %v905_v2  ;;  %vm154_vm3 = vcmask 261120   ;;  %v907_v23 = vmov 32.0   ;;  %v820_v2 = vld [vmem:[%s1204_s10] ss:$0 sm:$0xff]  ;;  %s908_s10 = smov 80  }
  0x15   :  { %v86_v9 = vand.u32 127, %v85_v7  ;;  %s1230_s29 = sld [smem:[#allocation13_spill]]  ;;  %830 = vrcp.f32 %v907_v23  ;;  %s909_s3 = smov 112   ;;  %vm270_vm11 = vcmask 130048  }
  0x16   :  { %s1231_s22 = sld [smem:[#allocation14_spill]]  ;;  %s910_s28 = smov 96  }
  0x17   :  { %s911_s9 = smov 16   ;;  %s912_s30 = smov [#allocation6]  }
  0x18   :  { %s704_s23 = sshll.u32 %s1215_s21, 4  ;;  %s705_s23 = int_to_ptr.hbm [resolvable:$true] %s704_s23 }
  0x19   :  { %v83_v0 = vld [vmem:[%s1228_s0] sm:$0xff]  ;;  %v84_v3 = vld [vmem:[%s1228_s0 + $0x8] sm:$0xff]  ;;  %s1232_s0 = sld [smem:[#allocation11_spill]] }
  0x1a   :  { %v788_v1 = vld [vmem:[%s1229_s5 + $0x18] sm:$0xff]  ;;  %88 = vperm.xlu0 %808, %v83_v0   ;;  %v787_v4 = vld [vmem:[%s1229_s5 + $0x10] sm:$0xff]  ;;  %v786_v5 = vld [vmem:[%s1229_s5 + $0x8] sm:$0xff] }
  0x1b   :  { %142 = vmatpush.bf16.msra.mxu0 %v788_v1  ;;  %v785_v6 = vld [vmem:[%s1229_s5] sm:$0xff]  ;;  %v109_v19 = vld [vmem:[%s1230_s29 + $0x8] sm:$0xff]  ;;  %v831_v24 = vpop.eup %830 }
  0x1c   :  { %v108_v15 = vld [vmem:[%s1230_s29] sm:$0xff]  ;;  %v162_v25 = vmul.f32 32.0, %v831_v24  ;;  %vm166_vm4 = vweird.f32 %v831_v24  ;;  %v790_v40 = vld [vmem:[%s1231_s22 + $0x8] sm:$0xff] }
  0x1d   :  { %246 = vmatpush.bf16.msra.mxu1 %v790_v40  ;;  %v789_v42 = vld [vmem:[%s1231_s22] sm:$0xff] }
  0x1e   :  { %v163_v26 = vsub.f32 1.0, %v162_v25 }
  0x1f   :  { %143 = vmatpush.bf16.msra.mxu0 %v787_v4  ;;  %v306_v25 = vld [vmem:[%s1232_s0] sm:$0xff] }
  0x20   :  { %v164_v27 = vmul.f32 %v831_v24, %v163_v26 }
  0x21   :  { %247 = vmatpush.bf16.msra.mxu1 %v789_v42 }
  0x22   :  { %91 = vperm.xlu0 %808, %v84_v3   ;;  %v165_v28 = vadd.f32 %v831_v24, %v164_v27 }
  0x23   :  { %144 = vmatpush.bf16.msra.mxu0 %v786_v5 }
  0x24   :  { %v1053_v29 = vsel %vm166_vm4, %v831_v24, %v165_v28 }
  0x27   :  { %145 = vmatpush.bf16.msra.mxu0 %v785_v6 }
  0x8c   :  { %v89_v8 = vpop.permute.xlu0 %88 }
  0x8d   :  { %vm93_vm0 = vcmp.eq.s32.totalorder %v89_v8, %v86_v9  ;;  %v821_v8 = vld [vmem:[%s1200_s6] ss:$0 sm:$0xff]  ;;  %s653_s6 = sld [smem:[#allocation3]] }
  0x8e   :  { %v716_v12 = vsel %vm93_vm0, 1.0, %v906_v11 }
  0x93   :  { %s654_s29 = scalar_lea.vmem [#allocation2], %s653_s6 }
  0x94   :  { %v92_v10 = vpop.permute.xlu0 %91 }
  0x95   :  { %vm94_vm1 = vcmp.eq.s32.totalorder %v92_v10, %v86_v9 }
  0x96   :  { %v717_v13 = vsel %vm94_vm1, 1.0, %v906_v11 }
  0x97   :  { %v99_v14 = vpack.c.bf16 %v717_v13, %v716_v12 }
  0x99   :  { %734 = vmatmul.msk.bf16.vlgmr.msra.gmra.mxu0 %vm134_vm2, %v99_v14 }
 0x116   :  { %v147_v16 = vpop.f32.mrf.mxu0 }
 0x117   :  { %v148_v17 = vadd.f32 %v147_v16, %v108_v15 }
 0x119   :  { %v155_v18 = vsel %vm154_vm3, %v148_v17, 0.0 }
 0x11a   :  { %156 = vadd.xlane.f32.xlu1 %v155_v18 }
 0x11e   :  { %v149_v20 = vpop.f32.mrf.mxu0 }
 0x11f   :  { %v150_v21 = vadd.f32 %v149_v20, %v109_v19 }
 0x121   :  { %v158_v22 = vsel %vm154_vm3, %v150_v21, 0.0 }
 0x122   :  { %159 = vadd.xlane.f32.xlu1 %v158_v22 }
 0x18d   :  { %v157_v30 = vpop.xlane.xlu1 %156 }
 0x18e   :  { %v168_v31 = vmul.f32 %v1053_v29, %v157_v30 }
 0x190   :  { %v170_v32 = vsub.f32 %v148_v17, %v168_v31  ;;  %v307_v31 = vld [vmem:[%s1232_s0 + $0x8] sm:$0xff] }
 0x192   :  { %v172_v33 = vmul.f32 %v170_v32, %v170_v32 }
 0x194   :  { %v174_v34 = vsel %vm154_vm3, %v172_v33, 0.0 }
 0x195   :  { %175 = vadd.xlane.f32.xlu2 %v174_v34  ;;  %v160_v35 = vpop.xlane.xlu1 %159 }
 0x196   :  { %v169_v36 = vmul.f32 %v1053_v29, %v160_v35 }
 0x198   :  { %v171_v37 = vsub.f32 %v150_v21, %v169_v36 }
 0x19a   :  { %v173_v38 = vmul.f32 %v171_v37, %v171_v37 }
 0x19c   :  { %v177_v39 = vsel %vm154_vm3, %v173_v38, 0.0  ;;  %v308_v38 = vld [vmem:[%s1232_s0 + $0x10] sm:$0xff] }
 0x19d   :  { %178 = vadd.xlane.f32.xlu2 %v177_v39 }
 0x208   :  { %v176_v41 = vpop.xlane.xlu2 %175 }
 0x209   :  { %v180_v43 = vmul.f32 %v176_v41, %v1053_v29 }
 0x20b   :  { %v182_v44 = vadd.f32 1e-12, %v180_v43 }
 0x20d   :  { %832 = vrsqrt.f32 %v182_v44  ;;  %vm190_vm6 = vweird.f32 %v182_v44 }
 0x210   :  { %v179_v45 = vpop.xlane.xlu2 %178 }
 0x211   :  { %v181_v46 = vmul.f32 %v179_v45, %v1053_v29  ;;  %v309_v45 = vld [vmem:[%s1232_s0 + $0x18] sm:$0xff] }
 0x213   :  { %v833_v47 = vpop.eup %832  ;;  %v183_v48 = vadd.f32 1e-12, %v181_v46 }
 0x214   :  { %v185_v49 = vmul.f32 %v833_v47, %v182_v44  ;;  %vm191_vm5 = vweird.f32 %v833_v47 }
 0x215   :  { %834 = vrsqrt.f32 %v183_v48  ;;  %vm192_vm7 = vmor %vm190_vm6, %vm191_vm5  ;;  %vm200_vm9 = vweird.f32 %v183_v48 }
 0x216   :  { %v186_v50 = vmul.f32 %v833_v47, %v185_v49 }
 0x218   :  { %v187_v51 = vmul.f32 0.5, %v186_v50 }
 0x21a   :  { %v188_v52 = vsub.f32 1.5, %v187_v51 }
 0x21b   :  { %v835_v53 = vpop.eup %834 }
 0x21c   :  { %v189_v54 = vmul.f32 %v833_v47, %v188_v52  ;;  %v195_v55 = vmul.f32 %v835_v53, %v183_v48  ;;  %vm201_vm8 = vweird.f32 %v835_v53 }
 0x21d   :  { %vm202_vm10 = vmor %vm200_vm9, %vm201_vm8  ;;  %vm662_vm9 = vcmask 1040384  }
 0x21e   :  { %v196_v56 = vmul.f32 %v835_v53, %v195_v55  ;;  %v193_v57 = vsel %vm192_vm7, %v833_v47, %v189_v54 }
 0x21f   :  { %v204_v60 = vmul.f32 %v193_v57, %v170_v32 }
 0x220   :  { %v197_v58 = vmul.f32 0.5, %v196_v56 }
 0x221   :  { %v209_v1 = vmul.f32 %v819_v61, %v204_v60 }
 0x222   :  { %v198_v59 = vsub.f32 1.5, %v197_v58 }
 0x223   :  { %v1073_v4 = vadd.f32 %v820_v2, %v209_v1 }
 0x224   :  { %v199_v62 = vmul.f32 %v835_v53, %v198_v59 }
 0x226   :  { %v203_v63 = vsel %vm202_vm10, %v835_v53, %v199_v62  ;;  %vm695_vm10 = vcmask 9216  }
 0x227   :  { %v205_v0 = vmul.f32 %v203_v63, %v171_v37 }
 0x229   :  { %v210_v3 = vmul.f32 %v819_v61, %v205_v0 }
 0x22b   :  { %v1075_v5 = vadd.f32 %v820_v2, %v210_v3  ;;  %v792_v3 = vld [vmem:[%s1201_s7 + $0x8] sm:$0xff] }
 0x22c   :  { %411 = vmatpush.bf16.msrb.mxu1 %v792_v3  ;;  %v798_v3 = vld [vmem:[%s1209_s15 + $0x18] sm:$0xff] }
 0x22d   :  { %v220_v6 = vpack.c.bf16 %v1075_v5, %v1073_v4 }
 0x22f   :  { %743 = vmatmul.msk.bf16.vlgmr.msra.gmra.mxu1 %vm154_vm3, %v220_v6  ;;  %v791_v6 = vld [vmem:[%s1201_s7] sm:$0xff] }
 0x230   :  { %412 = vmatpush.bf16.msrb.mxu1 %v791_v6  ;;  %v797_v6 = vld [vmem:[%s1209_s15 + $0x10] sm:$0xff] }
 0x234   :  { %583 = vmatpush.bf16.msra.mxu1 %v798_v3 }
 0x238   :  { %584 = vmatpush.bf16.msra.mxu1 %v797_v6 }
 0x2ac   :  { %v249_v7 = vpop.f32.mrf.mxu1 }
 0x2ad   :  { %v250_v10 = vadd.f32 %v821_v8, %v249_v7 }
 0x2b4   :  { %v251_v9 = vpop.f32.mrf.mxu1 }
 0x2b5   :  { %v252_v11 = vadd.f32 %v821_v8, %v251_v9 }
 0x2b7   :  { %v809_v12 = vpack.i.bf16 %v252_v11, %v250_v10  ;;  %v262_v13 = vpack.c.bf16 %v252_v11, %v250_v10 }
 0x2b9   :  { %810 = vrot.lane.b32.xlu0 %v809_v12, %s908_s10  ;;  %266 = vrot.lane.b32.xlu2 %v262_v13, %s909_s3 }
 0x313   :  { %v267_v20 = vpop.permute.xlu2 %266 }
 0x314   :  { %v278_v22 = vsel %vm270_vm11, %v267_v20, 0 }
 0x32b   :  { %v811_v14 = vpop.permute.xlu0 %810 }
 0x32c   :  { %v813_v15 = vunpack.i.h.bf16 %v811_v14  ;;  %v812_v16 = vunpack.i.l.bf16 %v811_v14 }
 0x32e   :  { %v263_v17 = vpack.c.bf16 %v813_v15, %v812_v16 }
 0x330   :  { %268 = vrot.lane.b32.xlu1 %v263_v17, %s909_s3 }
 0x338   :  { %346 = vrot.lane.b32.xlu1 %v263_v17, %s910_s28 }
 0x340   :  { %344 = vrot.lane.b32.xlu1 %v262_v13, %s910_s28 }
 0x3a2   :  { %v269_v18 = vpop.permute.xlu1 %268 }
 0x3a3   :  { %v281_v19 = vsel %vm270_vm11, %v269_v18, 0  ;;  %v822_v18 = vld [vmem:[%s1202_s8] ss:$0 sm:$0xff] }
 0x3a4   :  { %289 = vmatpush.bf16.xpose.msra.mxu2 %v281_v19 }
 0x3aa   :  { %v347_v21 = vpop.permute.xlu1 %346 }
 0x3ab   :  { %362 = vmatpush.bf16.msra.mxu3 %v347_v21 }
 0x3ac   :  { %290 = vmatpush.bf16.xpose.msra.mxu2 %v278_v22 }
 0x3b2   :  { %v345_v23 = vpop.permute.xlu1 %344 }
 0x3b3   :  { %744 = vmatmul.msk.bf16.vlgmr.msra.gmra.mxu2 %vm270_vm11, %v262_v13  ;;  %363 = vmatpush.bf16.msra.mxu3 %v345_v23 }
 0x3c3   :  { %745 = vmatmul.msk.bf16.gmra.mxu2 %vm270_vm11, %v263_v17 }
 0x436   :  { %v292_v24 = vpop.f32.mrf.mxu2 }
 0x437   :  { %v302_v26 = vmul.f32 0.25, %v292_v24 }
 0x439   :  { %v310_v27 = vadd.f32 %v306_v25, %v302_v26 }
 0x43b   :  { %v314_v28 = vmul.f32 1.442695, %v310_v27 }
 0x43d   :  { %836 = vpow2.f32 %v314_v28 }
 0x43e   :  { %v294_v30 = vpop.f32.mrf.mxu2 }
 0x43f   :  { %v303_v32 = vmul.f32 0.25, %v294_v30 }
 0x441   :  { %v311_v33 = vadd.f32 %v307_v31, %v303_v32 }
 0x443   :  { %v837_v34 = vpop.eup %836  ;;  %v316_v35 = vmul.f32 1.442695, %v311_v33 }
 0x444   :  { %v322_v36 = vsel %vm154_vm3, %v837_v34, 0.0 }
 0x445   :  { %838 = vpow2.f32 %v316_v35  ;;  %323 = vadd.xlane.f32.xlu0 %v322_v36 }
 0x446   :  { %v297_v37 = vpop.f32.mrf.mxu2 }
 0x447   :  { %v304_v39 = vmul.f32 0.25, %v297_v37 }
 0x449   :  { %v312_v40 = vadd.f32 %v308_v38, %v304_v39  ;;  %v793_v38 = vld [vmem:[%s1207_s13] sm:$0xff] }
 0x44b   :  { %v839_v41 = vpop.eup %838  ;;  %v318_v42 = vmul.f32 1.442695, %v312_v40 }
 0x44c   :  { %v325_v43 = vsel %vm154_vm3, %v839_v41, 0.0 }
 0x44d   :  { %840 = vpow2.f32 %v318_v42  ;;  %326 = vadd.xlane.f32.xlu2 %v325_v43 }
 0x44e   :  { %v299_v44 = vpop.f32.mrf.mxu2 }
 0x44f   :  { %v305_v46 = vmul.f32 0.25, %v299_v44 }
 0x451   :  { %v313_v47 = vadd.f32 %v309_v45, %v305_v46 }
 0x453   :  { %v841_v48 = vpop.eup %840  ;;  %v320_v49 = vmul.f32 1.442695, %v313_v47 }
 0x454   :  { %v328_v50 = vsel %vm154_vm3, %v841_v48, 0.0 }
 0x455   :  { %842 = vpow2.f32 %v320_v49  ;;  %329 = vadd.xlane.f32.xlu1 %v328_v50 }
 0x45b   :  { %v843_v51 = vpop.eup %842 }
 0x45c   :  { %v331_v52 = vsel %vm154_vm3, %v843_v51, 0.0 }
 0x45d   :  { %332 = vadd.xlane.f32.xlu0 %v331_v52 }
 0x4b8   :  { %v324_v53 = vpop.xlane.xlu0 %323 }
 0x4b9   :  { %844 = vrcp.f32 %v324_v53 }
 0x4bf   :  { %v845_v55 = vpop.eup %844 }
 0x4c0   :  { %v327_v54 = vpop.xlane.xlu2 %326  ;;  %v338_v57 = vmul.f32 %v845_v55, %v837_v34 }
 0x4c1   :  { %846 = vrcp.f32 %v327_v54 }
 0x4c7   :  { %v847_v56 = vpop.eup %846 }
 0x4c8   :  { %v339_v58 = vmul.f32 %v847_v56, %v839_v41  ;;  %v330_v60 = vpop.xlane.xlu1 %329 }
 0x4c9   :  { %848 = vrcp.f32 %v330_v60 }
 0x4ca   :  { %v342_v59 = vpack.c.bf16 %v339_v58, %v338_v57  ;;  %v823_v57 = vld [vmem:[%s1205_s11] ss:$0 sm:$0xff]  ;;  %s702_s11 = sshll.u32 %s912_s30, 4  ;;  %s703_s11 = int_to_ptr.vmem [resolvable:$true] %s702_s11 }
 0x4cc   :  { %746 = vmatmul.msk.bf16.vlgmr.msra.gmra.mxu3 %vm154_vm3, %v342_v59 }
 0x4cf   :  { %v849_v62 = vpop.eup %848 }
 0x4d0   :  { %v333_v61 = vpop.xlane.xlu0 %332  ;;  %v340_v0 = vmul.f32 %v849_v62, %v841_v48  ;;  %v824_v62 = vld [vmem:[%s1206_s12] ss:$0 sm:$0xff] }
 0x4d1   :  { %850 = vrcp.f32 %v333_v61 }
 0x4d7   :  { %v851_v63 = vpop.eup %850 }
 0x4d8   :  { %v341_v1 = vmul.f32 %v851_v63, %v843_v51 }
 0x4da   :  { %v343_v2 = vpack.c.bf16 %v341_v1, %v340_v0 }
 0x4dc   :  { %747 = vmatmul.msk.bf16.gmra.mxu3 %vm154_vm3, %v343_v2 }
 0x54f   :  { %v365_v7 = vpop.f32.mrf.mxu3 }
 0x557   :  { %v367_v8 = vpop.f32.mrf.mxu3 }
 0x55f   :  { %v370_v9 = vpop.f32.mrf.mxu3 }
 0x567   :  { %v372_v10 = vpop.f32.mrf.mxu3 }
 0x568   :  { %v814_v11 = vpack.i.bf16 %v372_v10, %v370_v9  ;;  %v795_v9 = vld [vmem:[%s1209_s15] sm:$0xff] }
 0x56a   :  { %815 = vrot.lane.b32.xlu0 %v814_v11, %s911_s9 }
 0x5dc   :  { %v816_v12 = vpop.permute.xlu0 %815 }
 0x5dd   :  { %v818_v13 = vunpack.i.h.bf16 %v816_v12  ;;  %v817_v14 = vunpack.i.l.bf16 %v816_v12 }
 0x5df   :  { %v384_v15 = vsel %vm270_vm11, %v367_v8, %v818_v13  ;;  %v383_v16 = vsel %vm270_vm11, %v365_v7, %v817_v14  ;;  %v796_v7 = vld [vmem:[%s1209_s15 + $0x8] sm:$0xff]  ;;  %v825_v8 = vld [vmem:[%s1208_s14] ss:$0 sm:$0xff] }
 0x5e0   :  { %v389_v17 = vpack.c.bf16 %v384_v15, %v383_v16  ;;  %585 = vmatpush.bf16.msra.mxu1 %v796_v7 }
 0x5e2   :  { %756 = vmatmul.msk.bf16.vlgmr.msrb.gmra.mxu1 %vm154_vm3, %v389_v17 }
 0x5e4   :  { %586 = vmatpush.bf16.msra.mxu1 %v795_v9  ;;  %v828_v9 = vld [vmem:[%s1212_s18] ss:$0 sm:$0xff] }
 0x65f   :  { %v414_v19 = vpop.f32.mrf.mxu1 }
 0x660   :  { %v419_v20 = vadd.f32 %v414_v19, %v1073_v4 }
 0x662   :  { %v425_v21 = vadd.f32 %v822_v18, %v419_v20 }
 0x664   :  { %v429_v22 = vsel %vm154_vm3, %v425_v21, 0.0 }
 0x665   :  { %430 = vadd.xlane.f32.xlu2 %v429_v22 }
 0x667   :  { %v416_v23 = vpop.f32.mrf.mxu1 }
 0x668   :  { %v420_v24 = vadd.f32 %v416_v23, %v1075_v5  ;;  %v794_v5 = vld [vmem:[%s1207_s13 + $0x8] sm:$0xff] }
 0x669   :  { %513 = vmatpush.bf16.msrb.mxu0 %v794_v5 }
 0x66a   :  { %v426_v25 = vadd.f32 %v822_v18, %v420_v24 }
 0x66c   :  { %v432_v26 = vsel %vm154_vm3, %v426_v25, 0.0 }
 0x66d   :  { %433 = vadd.xlane.f32.xlu2 %v432_v26  ;;  %514 = vmatpush.bf16.msrb.mxu0 %v793_v38 }
 0x6d8   :  { %v431_v27 = vpop.xlane.xlu2 %430 }
 0x6d9   :  { %v435_v28 = vmul.f32 %v431_v27, %v1053_v29 }
 0x6db   :  { %v437_v30 = vsub.f32 %v425_v21, %v435_v28 }
 0x6dd   :  { %v439_v31 = vmul.f32 %v437_v30, %v437_v30 }
 0x6df   :  { %v441_v32 = vsel %vm154_vm3, %v439_v31, 0.0 }
 0x6e0   :  { %442 = vadd.xlane.f32.xlu0 %v441_v32  ;;  %v434_v4 = vpop.xlane.xlu2 %433 }
 0x6e1   :  { %v436_v33 = vmul.f32 %v434_v4, %v1053_v29 }
 0x6e3   :  { %v438_v34 = vsub.f32 %v426_v25, %v436_v33  ;;  %v826_v33 = vld [vmem:[%s1210_s16] ss:$0 sm:$0xff] }
 0x6e5   :  { %v440_v35 = vmul.f32 %v438_v34, %v438_v34 }
 0x6e7   :  { %v444_v36 = vsel %vm154_vm3, %v440_v35, 0.0 }
 0x6e8   :  { %445 = vadd.xlane.f32.xlu2 %v444_v36 }
 0x753   :  { %v443_v37 = vpop.xlane.xlu0 %442 }
 0x754   :  { %v447_v39 = vmul.f32 %v443_v37, %v1053_v29 }
 0x756   :  { %v449_v40 = vadd.f32 1e-12, %v447_v39 }
 0x758   :  { %852 = vrsqrt.f32 %v449_v40  ;;  %vm457_vm13 = vweird.f32 %v449_v40 }
 0x75b   :  { %v446_v41 = vpop.xlane.xlu2 %445 }
 0x75c   :  { %v448_v42 = vmul.f32 %v446_v41, %v1053_v29 }
 0x75e   :  { %v853_v43 = vpop.eup %852  ;;  %v450_v44 = vadd.f32 1e-12, %v448_v42 }
 0x75f   :  { %v452_v45 = vmul.f32 %v853_v43, %v449_v40  ;;  %vm458_vm12 = vweird.f32 %v853_v43 }
 0x760   :  { %854 = vrsqrt.f32 %v450_v44  ;;  %vm459_vm14 = vmor %vm457_vm13, %vm458_vm12  ;;  %vm467_vm0 = vweird.f32 %v450_v44 }
 0x761   :  { %v453_v46 = vmul.f32 %v853_v43, %v452_v45 }
 0x763   :  { %v454_v47 = vmul.f32 0.5, %v453_v46 }
 0x765   :  { %v455_v48 = vsub.f32 1.5, %v454_v47 }
 0x766   :  { %v855_v49 = vpop.eup %854 }
 0x767   :  { %v456_v50 = vmul.f32 %v853_v43, %v455_v48  ;;  %v462_v51 = vmul.f32 %v855_v49, %v450_v44  ;;  %vm468_vm15 = vweird.f32 %v855_v49 }
 0x768   :  { %vm469_vm1 = vmor %vm467_vm0, %vm468_vm15 }
 0x769   :  { %v463_v52 = vmul.f32 %v855_v49, %v462_v51  ;;  %v460_v53 = vsel %vm459_vm14, %v853_v43, %v456_v50 }
 0x76a   :  { %v471_v56 = vmul.f32 %v460_v53, %v437_v30 }
 0x76b   :  { %v464_v54 = vmul.f32 0.5, %v463_v52 }
 0x76c   :  { %v476_v61 = vmul.f32 %v823_v57, %v471_v56  ;;  %v665_v56 = vld [vmem:[%s1213_s19 + $0x8] sm:$0xff] }
 0x76d   :  { %v465_v55 = vsub.f32 1.5, %v464_v54  ;;  %v667_v54 = vld [vmem:[%s1213_s19 + $0x18] sm:$0xff] }
 0x76e   :  { %v481_v0 = vadd.f32 %v824_v62, %v476_v61  ;;  %687 = vmatpush.msrb.mxu3 %v667_v54 }
 0x76f   :  { %v466_v58 = vmul.f32 %v855_v49, %v465_v55  ;;  %v666_v55 = vld [vmem:[%s1213_s19 + $0x10] sm:$0xff] }
 0x770   :  { %688 = vmatpush.msrb.mxu3 %v666_v55 }
 0x771   :  { %v470_v59 = vsel %vm469_vm1, %v855_v49, %v466_v58 }
 0x772   :  { %v472_v60 = vmul.f32 %v470_v59, %v438_v34  ;;  %v664_v59 = vld [vmem:[%s1213_s19] sm:$0xff]  ;;  %689 = vmatpush.msrb.mxu3 %v665_v56 }
 0x774   :  { %v477_v63 = vmul.f32 %v823_v57, %v472_v60  ;;  %690 = vmatpush.msrb.mxu3 %v664_v59 }
 0x776   :  { %v482_v1 = vadd.f32 %v824_v62, %v477_v63 }
 0x778   :  { %v487_v2 = vpack.c.bf16 %v482_v1, %v481_v0 }
 0x77a   :  { %765 = vmatmul.msk.bf16.vlgmr.msrb.gmra.mxu0 %vm154_vm3, %v487_v2 }
 0x7f7   :  { %v516_v10 = vpop.f32.mrf.mxu0 }
 0x7f8   :  { %v517_v11 = vadd.f32 %v825_v8, %v516_v10 }
 0x7fa   :  { %v521_v12 = vmul.f32 %v517_v11, %v517_v11 }
 0x7fc   :  { %v523_v13 = vmul.f32 %v521_v12, %v517_v11 }
 0x7fe   :  { %v525_v14 = vmul.f32 0.044715, %v523_v13 }
 0x7ff   :  { %v518_v15 = vpop.f32.mrf.mxu0 }
 0x800   :  { %v527_v16 = vadd.f32 %v525_v14, %v517_v11  ;;  %v519_v17 = vadd.f32 %v825_v8, %v518_v15 }
 0x802   :  { %v529_v18 = vmul.f32 0.7978846, %v527_v16  ;;  %v522_v19 = vmul.f32 %v519_v17, %v519_v17 }
 0x804   :  { %v524_v20 = vmul.f32 %v522_v19, %v519_v17  ;;  %856 = vtanh.f32 %v529_v18 }
 0x806   :  { %v526_v21 = vmul.f32 0.044715, %v524_v20 }
 0x808   :  { %v528_v22 = vadd.f32 %v526_v21, %v519_v17 }
 0x80a   :  { %v530_v23 = vmul.f32 0.7978846, %v528_v22  ;;  %v857_v24 = vpop.eup %856 }
 0x80b   :  { %v533_v25 = vadd.f32 1.0, %v857_v24  ;;  %v829_v24 = vld [vmem:[%s1214_s20] ss:$0 sm:$0xff] }
 0x80c   :  { %858 = vtanh.f32 %v530_v23 }
 0x80d   :  { %v535_v27 = vmul.f32 0.5, %v533_v25 }
 0x80f   :  { %v537_v31 = vmul.f32 %v535_v27, %v517_v11 }
 0x812   :  { %v859_v26 = vpop.eup %858 }
 0x813   :  { %v534_v28 = vadd.f32 1.0, %v859_v26 }
 0x815   :  { %v536_v30 = vmul.f32 0.5, %v534_v28 }
 0x817   :  { %v538_v32 = vmul.f32 %v536_v30, %v519_v17 }
 0x819   :  { %v547_v4 = vpack.c.bf16 %v538_v32, %v537_v31 }
 0x81b   :  { %782 = vmatmul.msk.bf16.vlgmr.msra.gmra.mxu1 %vm134_vm2, %v547_v4 }
 0x898   :  { %v588_v34 = vpop.f32.mrf.mxu1 }
 0x899   :  { %v589_v35 = vadd.f32 %v826_v33, %v588_v34 }
 0x89b   :  { %v593_v36 = vadd.f32 %v589_v35, %v481_v0 }
 0x89d   :  { %v597_v5 = vsel %vm154_vm3, %v593_v36, 0.0 }
 0x89e   :  { %598 = vadd.xlane.f32.xlu1 %v597_v5 }
 0x8a0   :  { %v590_v37 = vpop.f32.mrf.mxu1 }
 0x8a1   :  { %v591_v38 = vadd.f32 %v826_v33, %v590_v37 }
 0x8a3   :  { %v594_v39 = vadd.f32 %v591_v38, %v482_v1 }
 0x8a5   :  { %v600_v40 = vsel %vm154_vm3, %v594_v39, 0.0 }
 0x8a6   :  { %601 = vadd.xlane.f32.xlu2 %v600_v40 }
 0x911   :  { %v599_v41 = vpop.xlane.xlu1 %598 }
 0x912   :  { %v603_v42 = vmul.f32 %v599_v41, %v1053_v29 }
 0x914   :  { %v605_v43 = vsub.f32 %v593_v36, %v603_v42 }
 0x916   :  { %v607_v44 = vmul.f32 %v605_v43, %v605_v43 }
 0x918   :  { %v609_v45 = vsel %vm154_vm3, %v607_v44, 0.0 }
 0x919   :  { %v602_v46 = vpop.xlane.xlu2 %601  ;;  %610 = vadd.xlane.f32.xlu1 %v609_v45 }
 0x91a   :  { %v604_v47 = vmul.f32 %v602_v46, %v1053_v29 }
 0x91c   :  { %v606_v48 = vsub.f32 %v594_v39, %v604_v47 }
 0x91e   :  { %v608_v49 = vmul.f32 %v606_v48, %v606_v48 }
 0x920   :  { %v612_v50 = vsel %vm154_vm3, %v608_v49, 0.0 }
 0x921   :  { %613 = vadd.xlane.f32.xlu2 %v612_v50 }
 0x98c   :  { %v611_v51 = vpop.xlane.xlu1 %610 }
 0x98d   :  { %v615_v52 = vmul.f32 %v611_v51, %v1053_v29 }
 0x98f   :  { %v617_v53 = vadd.f32 1e-12, %v615_v52 }
 0x991   :  { %860 = vrsqrt.f32 %v617_v53  ;;  %vm625_vm4 = vweird.f32 %v617_v53 }
 0x994   :  { %v614_v57 = vpop.xlane.xlu2 %613 }
 0x995   :  { %v616_v58 = vmul.f32 %v614_v57, %v1053_v29  ;;  %v827_v29 = vld [vmem:[%s1211_s17] ss:$0 sm:$0xff]  ;;  %s783_s17 = sld [smem:[#allocation3 + $0x1]] }
 0x997   :  { %v861_v60 = vpop.eup %860  ;;  %v618_v61 = vadd.f32 1e-12, %v616_v58 }
 0x998   :  { %v620_v62 = vmul.f32 %v861_v60, %v617_v53  ;;  %vm626_vm2 = vweird.f32 %v861_v60 }
 0x999   :  { %862 = vrsqrt.f32 %v618_v61  ;;  %vm627_vm5 = vmor %vm625_vm4, %vm626_vm2  ;;  %vm635_vm7 = vweird.f32 %v618_v61 }
 0x99a   :  { %v621_v63 = vmul.f32 %v861_v60, %v620_v62 }
 0x99b   :  { %s657_s18 = scalar_lea.vmem [#allocation2], %s783_s17 }
 0x99c   :  { %v622_v0 = vmul.f32 0.5, %v621_v63 }
 0x99e   :  { %v623_v1 = vsub.f32 1.5, %v622_v0 }
 0x99f   :  { %v863_v2 = vpop.eup %862 }
 0x9a0   :  { %v624_v3 = vmul.f32 %v861_v60, %v623_v1  ;;  %v630_v6 = vmul.f32 %v863_v2, %v618_v61  ;;  %vm636_vm6 = vweird.f32 %v863_v2 }
 0x9a1   :  { %vm637_vm8 = vmor %vm635_vm7, %vm636_vm6 }
 0x9a2   :  { %v628_v7 = vsel %vm627_vm5, %v861_v60, %v624_v3  ;;  %v631_v8 = vmul.f32 %v863_v2, %v630_v6 }
 0x9a3   :  { %v639_v10 = vmul.f32 %v628_v7, %v605_v43 }
 0x9a4   :  { %v632_v11 = vmul.f32 0.5, %v631_v8 }
 0x9a5   :  { %v644_v12 = vmul.f32 %v827_v29, %v639_v10 }
 0x9a6   :  { %v633_v13 = vsub.f32 1.5, %v632_v11 }
 0x9a7   :  { %v649_v14 = vadd.f32 %v828_v9, %v644_v12 }
 0x9a8   :  { %v634_v15 = vmul.f32 %v863_v2, %v633_v13 }
 0x9a9   :  { %651 = vst.msk [vmem:[#allocation2] sm:$0xff] %vm154_vm3, %v649_v14 }
 0x9aa   :  { %v638_v16 = vsel %vm637_vm8, %v863_v2, %v634_v15 }
 0x9ab   :  { %v640_v17 = vmul.f32 %v638_v16, %v606_v48 }
 0x9ad   :  { %v645_v18 = vmul.f32 %v827_v29, %v640_v17 }
 0x9af   :  { %v650_v19 = vadd.f32 %v828_v9, %v645_v18 }
 0x9b1   :  { %652 = vst.msk [vmem:[#allocation2 + $0x8] sm:$0xff] %vm154_vm3, %v650_v19 }
 0x9b8   :  { %v658_v20 = vld [vmem:[%s657_s18] sm:$0x1] }
 0x9b9   :  { %v660_v21 = vrot.slane %v658_v20, 7  ;;  %v655_v22 = vld [vmem:[%s654_s29] sm:$0x1] }
 0x9bb   :  { %v663_v23 = vsel %vm662_vm9, %v655_v22, %v660_v21 }
 0x9bc   :  { %784 = vmatmul.msk.f32.vlgmr.msrb.gmra.mxu3 %vm154_vm3, %v663_v23 }
 0xa3f   :  { %v692_v25 = vpop.f32.mrf.mxu3 }
 0xa40   :  { %v693_v26 = vadd.f32 %v829_v24, %v692_v25 }
 0xa42   :  { %696 = vst.msk [vmem:[#allocation6] sm:$0x3] %vm695_vm10, %v693_v26 }
 0xa43   :  { %707 = dma.vmem_to_hbm [thread:$0]  %s703_s11, 32, %s705_s23, [#allocation4]  }
 0xa44   :  { %902 = dma.done.wait [#allocation4], 32  }
 0xa45   :  { %903 = vsyncadd [#allocation4], 4294967264 }
 0xa46   :  { %712 = vsyncpa [#allocation4], 1 }
 0xa47   :  { %713 = vsyncpa [#allocation5], 1 }

</bundles_post_ra>
